<compile_context>
chip_gen: v7x
topology: tpu7x:2x2x1
jax: 0.10.0
libtpu: 0.0.40
codegen_flags: <defaults>
</compile_context>

<pallas_src>
import jax
import jax.numpy as jnp
from jax.experimental import pallas as pl
from jax.experimental.pallas import tpu as pltpu


def _attention_kernel(enc_out_ref, enc_feat_ref, h_ref, mask_ref,
                      cov_col_ref, cov_row_ref,
                      wdp_ref, bdp_ref, wc_ref, v_ref,
                      ctx_ref, attn_ref, cov_out_ref):
    # Per-grid-step shapes (R = batch rows per step):
    #   enc_out_ref, enc_feat_ref : (R, m, n)
    #   h_ref                     : (R, n)
    #   mask_ref, cov_row_ref     : (R, 1, m)
    #   cov_col_ref               : (R, m, 1)
    #   wdp_ref                   : (n, n)    (pre-transposed: in x out)
    #   bdp_ref                   : (1, n)
    #   wc_ref, v_ref             : (1, 1, n)
    # Outputs: ctx_ref (R, 1, n), attn_ref (R, 1, m), cov_out_ref (R, 1, m)
    r, m, n = enc_out_ref.shape

    # dec_feature = decode_proj(h_c_hat): one (R, n) @ (n, n) MXU matmul per step.
    dec = jnp.dot(h_ref[...], wdp_ref[...],
                  preferred_element_type=jnp.float32) + bdp_ref[...]        # (R, n)

    # att_feature = enc_feature + dec (broadcast over m) + coverage * w_c
    att = (enc_feat_ref[...]
           + dec[:, None, :]
           + cov_col_ref[...] * wc_ref[...])                                # (R, m, n)
    t = jnp.tanh(att)

    # scores = v(tanh(att_feature)) on the MXU; m stays on the lane axis.
    vb = jnp.broadcast_to(v_ref[...], (r, 1, n))                            # (R, 1, n)
    s = jnp.einsum('bqd,bkd->bqk', vb, t,
                   preferred_element_type=jnp.float32)                      # (R, 1, m)

    # Masked softmax over the source dim with the mask folded into a single
    # normalization:  e*(1-mask) / sum(e*(1-mask))  ==  renorm(softmax(s)*(1-mask)).
    s = s - jnp.max(s, axis=-1, keepdims=True)
    e = jnp.exp(s) * (1.0 - mask_ref[...])
    denom = jnp.sum(e, axis=-1, keepdims=True)
    # Exact divide (not pl.reciprocal(approx=True)) to hold 1e-5 vs. the reference.
    # Matches torch behaviour (NaN) if an entire row is padded.
    attn = e / denom                                                        # (R, 1, m)

    # context vector: batched (1, m) @ (m, n) on the MXU.
    ctx = jnp.einsum('bqk,bkd->bqd', attn, enc_out_ref[...],
                     preferred_element_type=jnp.float32)                    # (R, 1, n)

    ctx_ref[...] = ctx.astype(ctx_ref.dtype)
    attn_ref[...] = attn.astype(attn_ref.dtype)
    cov_out_ref[...] = (cov_row_ref[...] + attn).astype(cov_out_ref.dtype)


def _choose_block_rows(b, m, n, *, itemsize=4, budget_bytes=12 << 20):
    """Rows per grid step so the double-buffered streamed inputs fit the budget."""
    per_row = 2 * 2 * m * n * itemsize            # 2 big inputs x 2 pipeline buffers
    r = max(1, budget_bytes // per_row)
    if r >= b or b <= 8:
        return b
    # When blocking below the full batch, keep R a multiple of 8 so 2-D blocks
    # like (R, n) stay sublane-aligned.
    return int(max(8, (r // 8) * 8))


def attention_forward(h_c_hat, enc_outputs, enc_feature, enc_padding_mask,
                      coverage, params, *, block_rows=None):
    """Pallas version of Attention.forward (use_coverage=True)."""
    b, m, n = enc_outputs.shape
    enc_feature = enc_feature.reshape(b, m, n)

    if block_rows is None:
        block_rows = _choose_block_rows(b, m, n)
    r = int(block_rows)
    grid = (pl.cdiv(b, r),)

    w_dp_t = params["decode_proj_w"].T                 # (n, n)  in x out
    b_dp = params["decode_proj_b"].reshape(1, n)       # (1, n)
    wc = params["w_c_w"].reshape(1, 1, n)              # Linear(1, n) weight (n,1) -> row
    v = params["v_w"].reshape(1, 1, n)                 # Linear(n, 1) weight (1,n) -> row

    mask3 = enc_padding_mask.reshape(b, 1, m)          # m on lanes
    cov_col = coverage.reshape(b, m, 1)                # for the coverage feature
    cov_row = coverage.reshape(b, 1, m)                # for the coverage update

    in_specs = [
        pl.BlockSpec((r, m, n), lambda i: (i, 0, 0)),   # enc_outputs
        pl.BlockSpec((r, m, n), lambda i: (i, 0, 0)),   # enc_feature
        pl.BlockSpec((r, n), lambda i: (i, 0)),         # h_c_hat
        pl.BlockSpec((r, 1, m), lambda i: (i, 0, 0)),   # enc_padding_mask (row form)
        pl.BlockSpec((r, m, 1), lambda i: (i, 0, 0)),   # coverage (column form)
        pl.BlockSpec((r, 1, m), lambda i: (i, 0, 0)),   # coverage (row form)
        pl.BlockSpec((n, n), lambda i: (0, 0)),         # decode_proj W^T
        pl.BlockSpec((1, n), lambda i: (0, 0)),         # decode_proj bias
        pl.BlockSpec((1, 1, n), lambda i: (0, 0, 0)),   # w_c weight
        pl.BlockSpec((1, 1, n), lambda i: (0, 0, 0)),   # v weight
    ]
    out_specs = [
        pl.BlockSpec((r, 1, n), lambda i: (i, 0, 0)),   # context_vec
        pl.BlockSpec((r, 1, m), lambda i: (i, 0, 0)),   # attn_dist
        pl.BlockSpec((r, 1, m), lambda i: (i, 0, 0)),   # coverage (updated)
    ]
    out_shape = (
        jax.ShapeDtypeStruct((b, 1, n), jnp.float32),
        jax.ShapeDtypeStruct((b, 1, m), jnp.float32),
        jax.ShapeDtypeStruct((b, 1, m), jnp.float32),
    )

    ctx3, attn3, cov3 = pl.pallas_call(
        _attention_kernel,
        grid=grid,
        in_specs=in_specs,
        out_specs=out_specs,
        out_shape=out_shape,
        compiler_params=pltpu.CompilerParams(
            dimension_semantics=("parallel",),
            vmem_limit_bytes=48 * 1024 * 1024),
    )(enc_outputs, enc_feature, h_c_hat, mask3, cov_col, cov_row,
      w_dp_t, b_dp, wc, v)

    # Free metadata reshapes back to the module's output shapes.
    return ctx3.reshape(b, n), attn3.reshape(b, m), cov3.reshape(b, m)


def attention_reference(h_c_hat, enc_outputs, enc_feature, enc_padding_mask,
                        coverage, params):
    """Pure-JAX reference mirroring the torch module exactly."""
    b, m, n = enc_outputs.shape
    dec = h_c_hat @ params["decode_proj_w"].T + params["decode_proj_b"]
    att = (enc_feature.reshape(b, m, n) + dec[:, None, :]
           + coverage[..., None] * params["w_c_w"][:, 0][None, None, :])
    scores = jnp.tanh(att) @ params["v_w"][0]            # (b, m)
    sm = jax.nn.softmax(scores, axis=1)
    attn = sm * (1.0 - enc_padding_mask)
    attn = attn / attn.sum(1, keepdims=True)
    ctx = jnp.einsum("bm,bmn->bn", attn, enc_outputs)
    cov_new = coverage + attn
    return ctx, attn, cov_new


if __name__ == "__main__":
    hid_size = 16
    n = 2 * hid_size          # 32
    b, m = 2, 8

    key = jax.random.PRNGKey(0)
    keys = jax.random.split(key, 8)

    # Deterministic synthetic parameters (shapes from Attention.__init__).
    params = {
        "decode_proj_w": 0.1 * jax.random.normal(keys[0], (n, n), jnp.float32),
        "decode_proj_b": 0.1 * jax.random.normal(keys[1], (n,), jnp.float32),
        "w_c_w": 0.1 * jax.random.normal(keys[2], (n, 1), jnp.float32),
        "v_w": 0.1 * jax.random.normal(keys[3], (1, n), jnp.float32),
    }

    # Inputs.
    enc_outputs = jax.random.normal(keys[4], (b, m, n), jnp.float32)
    enc_feature = jax.random.normal(keys[5], (b * m, n), jnp.float32)
    h_c_hat = jax.random.normal(keys[6], (b, n), jnp.float32)
    lengths = jnp.array([6, 7], dtype=jnp.int32)
    enc_padding_mask = (jnp.arange(m)[None, :] >= lengths[:, None]).astype(jnp.float32)
    coverage = 0.1 * jax.random.uniform(keys[7], (b, m), jnp.float32)

    ctx, attn, cov_new = attention_forward(
        h_c_hat, enc_outputs, enc_feature, enc_padding_mask, coverage, params)
    jax.block_until_ready((ctx, attn, cov_new))

    ctx_ref, attn_ref, cov_ref = attention_reference(
        h_c_hat, enc_outputs, enc_feature, enc_padding_mask, coverage, params)

    assert jnp.allclose(ctx, ctx_ref, rtol=1e-5, atol=1e-5)
    assert jnp.allclose(attn, attn_ref, rtol=1e-5, atol=1e-5)
    assert jnp.allclose(cov_new, cov_ref, rtol=1e-5, atol=1e-5)

    print("KERNEL_OK")
</pallas_src>

<mosaic_0001>
module attributes {stable_mosaic.version = 11 : i64} {
  func.func @_attention_kernel(%arg0: i32, %arg1: memref<2x8x32xf32, #tpu.memory_space<vmem>>, %arg2: memref<2x8x32xf32, #tpu.memory_space<vmem>>, %arg3: memref<2x32xf32, #tpu.memory_space<vmem>>, %arg4: memref<2x1x8xf32, #tpu.memory_space<vmem>>, %arg5: memref<2x8x1xf32, #tpu.memory_space<vmem>>, %arg6: memref<2x1x8xf32, #tpu.memory_space<vmem>>, %arg7: memref<32x32xf32, #tpu.memory_space<vmem>>, %arg8: memref<1x32xf32, #tpu.memory_space<vmem>>, %arg9: memref<1x1x32xf32, #tpu.memory_space<vmem>>, %arg10: memref<1x1x32xf32, #tpu.memory_space<vmem>>, %arg11: memref<2x1x32xf32, #tpu.memory_space<vmem>>, %arg12: memref<2x1x8xf32, #tpu.memory_space<vmem>>, %arg13: memref<2x1x8xf32, #tpu.memory_space<vmem>>) attributes {dimension_semantics = [#tpu.dimension_semantics<parallel>], iteration_bounds = array<i64: 1>, scalar_prefetch = 0 : i64, scratch_operands = 0 : i64, tpu.core_type = #tpu.core_type<tc>, window_params = [{transform_indices = @transform_0, window_bounds = array<i64: 2, 8, 32>}, {transform_indices = @transform_1, window_bounds = array<i64: 2, 8, 32>}, {transform_indices = @transform_2, window_bounds = array<i64: 2, 32>}, {transform_indices = @transform_3, window_bounds = array<i64: 2, 1, 8>}, {transform_indices = @transform_4, window_bounds = array<i64: 2, 8, 1>}, {transform_indices = @transform_5, window_bounds = array<i64: 2, 1, 8>}, {pipeline_mode = #tpu.pipeline_mode<synchronous>, transform_indices = @transform_6, window_bounds = array<i64: 32, 32>}, {pipeline_mode = #tpu.pipeline_mode<synchronous>, transform_indices = @transform_7, window_bounds = array<i64: 1, 32>}, {pipeline_mode = #tpu.pipeline_mode<synchronous>, transform_indices = @transform_8, window_bounds = array<i64: 1, 1, 32>}, {pipeline_mode = #tpu.pipeline_mode<synchronous>, transform_indices = @transform_9, window_bounds = array<i64: 1, 1, 32>}, {transform_indices = @transform_10, window_bounds = array<i64: 2, 1, 32>}, {transform_indices = @transform_11, window_bounds = array<i64: 2, 1, 8>}, {transform_indices = @transform_12, window_bounds = array<i64: 2, 1, 8>}]} {
    %c0 = arith.constant 0 : index
    %c0_0 = arith.constant 0 : index
    %0 = vector.load %arg3[%c0, %c0_0] : memref<2x32xf32, #tpu.memory_space<vmem>>, vector<2x32xf32>
    %c0_1 = arith.constant 0 : index
    %c0_2 = arith.constant 0 : index
    %1 = vector.load %arg7[%c0_1, %c0_2] : memref<32x32xf32, #tpu.memory_space<vmem>>, vector<32x32xf32>
    %cst = arith.constant dense<0.000000e+00> : vector<2x32xf32>
    %2 = tpu.matmul %0, %1, %cst {dimension_numbers = #tpu.dot_dimension_numbers<[1], [0], [0], [1], [0, 0, 1, 1], [], []>} : vector<2x32xf32>, vector<32x32xf32>, vector<2x32xf32> -> vector<2x32xf32>
    %c0_3 = arith.constant 0 : index
    %c0_4 = arith.constant 0 : index
    %3 = vector.load %arg8[%c0_3, %c0_4] : memref<1x32xf32, #tpu.memory_space<vmem>>, vector<1x32xf32>
    %4 = vector.broadcast %3 : vector<1x32xf32> to vector<2x32xf32>
    %5 = arith.addf %2, %4 : vector<2x32xf32>
    %c0_5 = arith.constant 0 : index
    %c0_6 = arith.constant 0 : index
    %c0_7 = arith.constant 0 : index
    %6 = vector.load %arg2[%c0_5, %c0_6, %c0_7] : memref<2x8x32xf32, #tpu.memory_space<vmem>>, vector<2x8x32xf32>
    %7 = vector.shape_cast %5 : vector<2x32xf32> to vector<2x1x32xf32>
    %8 = vector.broadcast %7 : vector<2x1x32xf32> to vector<2x8x32xf32>
    %9 = arith.addf %6, %8 : vector<2x8x32xf32>
    %c0_8 = arith.constant 0 : index
    %c0_9 = arith.constant 0 : index
    %c0_10 = arith.constant 0 : index
    %10 = vector.load %arg5[%c0_8, %c0_9, %c0_10] : memref<2x8x1xf32, #tpu.memory_space<vmem>>, vector<2x8x1xf32>
    %c0_11 = arith.constant 0 : index
    %c0_12 = arith.constant 0 : index
    %c0_13 = arith.constant 0 : index
    %11 = vector.load %arg9[%c0_11, %c0_12, %c0_13] : memref<1x1x32xf32, #tpu.memory_space<vmem>>, vector<1x1x32xf32>
    %12 = vector.broadcast %10 : vector<2x8x1xf32> to vector<2x8x32xf32>
    %13 = vector.broadcast %11 : vector<1x1x32xf32> to vector<2x8x32xf32>
    %14 = arith.mulf %12, %13 : vector<2x8x32xf32>
    %15 = arith.addf %9, %14 : vector<2x8x32xf32>
    %16 = math.tanh %15 : vector<2x8x32xf32>
    %c0_14 = arith.constant 0 : index
    %c0_15 = arith.constant 0 : index
    %c0_16 = arith.constant 0 : index
    %17 = vector.load %arg10[%c0_14, %c0_15, %c0_16] : memref<1x1x32xf32, #tpu.memory_space<vmem>>, vector<1x1x32xf32>
    %18 = vector.shape_cast %17 : vector<1x1x32xf32> to vector<1x1x32xf32>
    %19 = vector.broadcast %18 : vector<1x1x32xf32> to vector<2x1x32xf32>
    "tpu.trace_start"() <{level = 10 : i32, message = "bqd,bkd->bqk"}> : () -> ()
    %cst_17 = arith.constant dense<0.000000e+00> : vector<2x1x8xf32>
    %20 = tpu.matmul %19, %16, %cst_17 {dimension_numbers = #tpu.dot_dimension_numbers<[2], [2], [1], [1], [0, 0, 0, 1, 1, 1], [0], [0]>} : vector<2x1x32xf32>, vector<2x8x32xf32>, vector<2x1x8xf32> -> vector<2x1x8xf32>
    "tpu.trace_stop"() : () -> ()
    %cst_18 = arith.constant dense<0xFF800000> : vector<2x1xf32>
    %21 = vector.multi_reduction <maximumf>, %20, %cst_18 [2] : vector<2x1x8xf32> to vector<2x1xf32>
    %22 = vector.shape_cast %21 : vector<2x1xf32> to vector<2x1x1xf32>
    %23 = vector.broadcast %22 : vector<2x1x1xf32> to vector<2x1x8xf32>
    %24 = arith.subf %20, %23 : vector<2x1x8xf32>
    %25 = math.exp %24 : vector<2x1x8xf32>
    %c0_19 = arith.constant 0 : index
    %c0_20 = arith.constant 0 : index
    %c0_21 = arith.constant 0 : index
    %26 = vector.load %arg4[%c0_19, %c0_20, %c0_21] : memref<2x1x8xf32, #tpu.memory_space<vmem>>, vector<2x1x8xf32>
    %cst_22 = arith.constant 1.000000e+00 : f32
    %27 = vector.broadcast %cst_22 : f32 to vector<2x1x8xf32>
    %28 = arith.subf %27, %26 : vector<2x1x8xf32>
    %29 = arith.mulf %25, %28 : vector<2x1x8xf32>
    %cst_23 = arith.constant dense<0.000000e+00> : vector<2x1xf32>
    %30 = vector.multi_reduction <add>, %29, %cst_23 [2] : vector<2x1x8xf32> to vector<2x1xf32>
    %31 = vector.shape_cast %30 : vector<2x1xf32> to vector<2x1x1xf32>
    %32 = vector.broadcast %31 : vector<2x1x1xf32> to vector<2x1x8xf32>
    %33 = arith.divf %29, %32 : vector<2x1x8xf32>
    %c0_24 = arith.constant 0 : index
    %c0_25 = arith.constant 0 : index
    %c0_26 = arith.constant 0 : index
    %34 = vector.load %arg1[%c0_24, %c0_25, %c0_26] : memref<2x8x32xf32, #tpu.memory_space<vmem>>, vector<2x8x32xf32>
    "tpu.trace_start"() <{level = 10 : i32, message = "bqk,bkd->bqd"}> : () -> ()
    %cst_27 = arith.constant dense<0.000000e+00> : vector<2x1x32xf32>
    %35 = tpu.matmul %33, %34, %cst_27 {dimension_numbers = #tpu.dot_dimension_numbers<[2], [1], [1], [2], [0, 0, 0, 1, 1, 2], [0], [0]>} : vector<2x1x8xf32>, vector<2x8x32xf32>, vector<2x1x32xf32> -> vector<2x1x32xf32>
    "tpu.trace_stop"() : () -> ()
    %c0_28 = arith.constant 0 : index
    %c0_29 = arith.constant 0 : index
    %c0_30 = arith.constant 0 : index
    %36 = vector.load %arg11[%c0_28, %c0_29, %c0_30] : memref<2x1x32xf32, #tpu.memory_space<vmem>>, vector<2x1x32xf32>
    tpu.vector_store %arg11[%c0_28, %c0_29, %c0_30], %35 {strides = array<i32>} : memref<2x1x32xf32, #tpu.memory_space<vmem>>, vector<2x1x32xf32>,
    %c0_31 = arith.constant 0 : index
    %c0_32 = arith.constant 0 : index
    %c0_33 = arith.constant 0 : index
    %37 = vector.load %arg12[%c0_31, %c0_32, %c0_33] : memref<2x1x8xf32, #tpu.memory_space<vmem>>, vector<2x1x8xf32>
    tpu.vector_store %arg12[%c0_31, %c0_32, %c0_33], %33 {strides = array<i32>} : memref<2x1x8xf32, #tpu.memory_space<vmem>>, vector<2x1x8xf32>,
    %c0_34 = arith.constant 0 : index
    %c0_35 = arith.constant 0 : index
    %c0_36 = arith.constant 0 : index
    %38 = vector.load %arg6[%c0_34, %c0_35, %c0_36] : memref<2x1x8xf32, #tpu.memory_space<vmem>>, vector<2x1x8xf32>
    %39 = arith.addf %38, %33 : vector<2x1x8xf32>
    %c0_37 = arith.constant 0 : index
    %c0_38 = arith.constant 0 : index
    %c0_39 = arith.constant 0 : index
    %40 = vector.load %arg13[%c0_37, %c0_38, %c0_39] : memref<2x1x8xf32, #tpu.memory_space<vmem>>, vector<2x1x8xf32>
    tpu.vector_store %arg13[%c0_37, %c0_38, %c0_39], %39 {strides = array<i32>} : memref<2x1x8xf32, #tpu.memory_space<vmem>>, vector<2x1x8xf32>,
    return
  }
  func.func @transform_0(%arg0: i32) -> (i32, i32, i32) {
    %c0_i32 = arith.constant 0 : i32
    %c0_i32_0 = arith.constant 0 : i32
    %c0_i32_1 = arith.constant 0 : i32
    return %arg0, %c0_i32, %c0_i32_0 : i32, i32, i32
  }
  func.func @transform_1(%arg0: i32) -> (i32, i32, i32) {
    %c0_i32 = arith.constant 0 : i32
    %c0_i32_0 = arith.constant 0 : i32
    %c0_i32_1 = arith.constant 0 : i32
    return %arg0, %c0_i32, %c0_i32_0 : i32, i32, i32
  }
  func.func @transform_2(%arg0: i32) -> (i32, i32) {
    %c0_i32 = arith.constant 0 : i32
    %c0_i32_0 = arith.constant 0 : i32
    return %arg0, %c0_i32 : i32, i32
  }
  func.func @transform_3(%arg0: i32) -> (i32, i32, i32) {
    %c0_i32 = arith.constant 0 : i32
    %c0_i32_0 = arith.constant 0 : i32
    %c0_i32_1 = arith.constant 0 : i32
    return %arg0, %c0_i32, %c0_i32_0 : i32, i32, i32
  }
  func.func @transform_4(%arg0: i32) -> (i32, i32, i32) {
    %c0_i32 = arith.constant 0 : i32
    %c0_i32_0 = arith.constant 0 : i32
    %c0_i32_1 = arith.constant 0 : i32
    return %arg0, %c0_i32, %c0_i32_0 : i32, i32, i32
  }
  func.func @transform_5(%arg0: i32) -> (i32, i32, i32) {
    %c0_i32 = arith.constant 0 : i32
    %c0_i32_0 = arith.constant 0 : i32
    %c0_i32_1 = arith.constant 0 : i32
    return %arg0, %c0_i32, %c0_i32_0 : i32, i32, i32
  }
  func.func @transform_6(%arg0: i32) -> (i32, i32) {
    %c0_i32 = arith.constant 0 : i32
    %c0_i32_0 = arith.constant 0 : i32
    %c0_i32_1 = arith.constant 0 : i32
    return %c0_i32, %c0_i32_0 : i32, i32
  }
  func.func @transform_7(%arg0: i32) -> (i32, i32) {
    %c0_i32 = arith.constant 0 : i32
    %c0_i32_0 = arith.constant 0 : i32
    %c0_i32_1 = arith.constant 0 : i32
    return %c0_i32, %c0_i32_0 : i32, i32
  }
  func.func @transform_8(%arg0: i32) -> (i32, i32, i32) {
    %c0_i32 = arith.constant 0 : i32
    %c0_i32_0 = arith.constant 0 : i32
    %c0_i32_1 = arith.constant 0 : i32
    %c0_i32_2 = arith.constant 0 : i32
    return %c0_i32, %c0_i32_0, %c0_i32_1 : i32, i32, i32
  }
  func.func @transform_9(%arg0: i32) -> (i32, i32, i32) {
    %c0_i32 = arith.constant 0 : i32
    %c0_i32_0 = arith.constant 0 : i32
    %c0_i32_1 = arith.constant 0 : i32
    %c0_i32_2 = arith.constant 0 : i32
    return %c0_i32, %c0_i32_0, %c0_i32_1 : i32, i32, i32
  }
  func.func @transform_10(%arg0: i32) -> (i32, i32, i32) {
    %c0_i32 = arith.constant 0 : i32
    %c0_i32_0 = arith.constant 0 : i32
    %c0_i32_1 = arith.constant 0 : i32
    return %arg0, %c0_i32, %c0_i32_0 : i32, i32, i32
  }
  func.func @transform_11(%arg0: i32) -> (i32, i32, i32) {
    %c0_i32 = arith.constant 0 : i32
    %c0_i32_0 = arith.constant 0 : i32
    %c0_i32_1 = arith.constant 0 : i32
    return %arg0, %c0_i32, %c0_i32_0 : i32, i32, i32
  }
  func.func @transform_12(%arg0: i32) -> (i32, i32, i32) {
    %c0_i32 = arith.constant 0 : i32
    %c0_i32_0 = arith.constant 0 : i32
    %c0_i32_1 = arith.constant 0 : i32
    return %arg0, %c0_i32, %c0_i32_0 : i32, i32, i32
  }
}

</mosaic_0001>

<bundles_post_ra>
// kernel: tpu_custom_call.1
= control target key start
LH: loop header
LB: loop body
LE: loop exit
PB: predicated region body
PF: predicated region fallthrough
CT: control target
= control target key end

     0   :  { %18 = vsyncpa [#allocation3], 0  ;;  %s1025_s0 = inlined_call_operand.hbm [shape: f32[2,8,32], index: 0, kind: input, shape index: {}]   ;;  %s1026_s1 = inlined_call_operand.hbm [shape: f32[2,8,32], index: 1, kind: input, shape index: {}]   ;;  %s1027_s2 = inlined_call_operand.vmem [shape: f32[2,32], index: 2, kind: input, shape index: {}]   ;;  %s1028_s3 = inlined_call_operand.vmem [shape: f32[2,1,8], index: 3, kind: input, shape index: {}]   ;;  %s1029_s4 = inlined_call_operand.vmem [shape: f32[2,8,1], index: 4, kind: input, shape index: {}]   ;;  %s1030_s5 = inlined_call_operand.vmem [shape: f32[2,1,8], index: 5, kind: input, shape index: {}]   ;;  %s1031_s6 = inlined_call_operand.vmem [shape: f32[32,32], index: 6, kind: input, shape index: {}]   ;;  %s1032_s7 = inlined_call_operand.vmem [shape: f32[1,32], index: 7, kind: input, shape index: {}]   ;;  %s1033_s8 = inlined_call_operand.vmem [shape: f32[1,1,32], index: 8, kind: input, shape index: {}]   ;;  %s1034_s9 = inlined_call_operand.vmem [shape: f32[1,1,32], index: 9, kind: input, shape index: {}]   ;;  %s1035_s10 = inlined_call_operand.hbm [shape: f32[2,1,32], index: 10, kind: output, shape index: {0}]   ;;  %s1036_s11 = inlined_call_operand.hbm [shape: f32[2,1,8], index: 11, kind: output, shape index: {1}]   ;;  %s1037_s12 = inlined_call_operand.hbm [shape: f32[2,1,8], index: 12, kind: output, shape index: {2}]  }
   0x1   :  { %19 = vsyncpa [#allocation6], 0 }
   0x2   :  { %20 = vsyncpa [#allocation4], 0 }
   0x3   :  { %21 = vsyncpa [#allocation9], 0  ;;  %s808_s21 = smov [#allocation2]   ;;  %s690_s25 = scalar_lea.hbm %s1025_s0, 256 }
   0x4   :  { %s27_s22 = sshll.u32 %s808_s21, 4  ;;  %p691_p0 = scmp.ne.s32.totalorder %s1025_s0, %s690_s25  ;;  %s28_s22 = int_to_ptr.vmem [resolvable:$true] %s27_s22 }
   0x5   :  { %p694_p1 = scmp.lt.u32.totalorder %s690_s25, %s1025_s0 }
   0x7   :  { %p696_p2 = pnand %p694_p1, %p691_p0 }
   0x9   :  { %699 = shalt.err (!%p696_p2)
}
   0xa   :  { %s700_s30 = scalar_lea.vmem %s28_s22, 256  ;;  %p705_p4 = scmp.lt.s32.totalorder %s28_s22, %s28_s22 }
   0xb   :  { %p701_p3 = scmp.ne.s32.totalorder %s28_s22, %s700_s30  ;;  %p706_p5 = scmp.lt.s32.totalorder %s700_s30, %s700_s30 }
   0xd   :  { %p707_p6 = por %p706_p5, %p705_p4 }
   0xf   :  { %p708_p7 = pnand %p707_p6, %p701_p3 }
  0x11   :  { %711 = shalt.err (!%p708_p7)
}
  0x12   :  { %s809_s13 = smov 128   ;;  %s810_s14 = smov 8  }
  0x13   :  { %33 = dma.hbm_to_vmem [thread:$0]  %s1025_s0, 256, %s28_s22, [#allocation3], %s809_s13, %s809_s13, %s810_s14  }
  0x14   :  { %s811_s17 = smov [#allocation5]   ;;  %s712_s21 = scalar_lea.hbm %s1026_s1, 256 }
  0x15   :  { %s39_s18 = sshll.u32 %s811_s17, 4  ;;  %p713_p8 = scmp.ne.s32.totalorder %s1026_s1, %s712_s21  ;;  %s40_s18 = int_to_ptr.vmem [resolvable:$true] %s39_s18 }
  0x16   :  { %p716_p9 = scmp.lt.u32.totalorder %s712_s21, %s1026_s1 }
  0x18   :  { %p718_p10 = pnand %p716_p9, %p713_p8 }
  0x1a   :  { %721 = shalt.err (!%p718_p10)
}
  0x1b   :  { %s722_s27 = scalar_lea.vmem %s40_s18, 256  ;;  %p727_p12 = scmp.lt.s32.totalorder %s40_s18, %s40_s18 }
  0x1c   :  { %p723_p11 = scmp.ne.s32.totalorder %s40_s18, %s722_s27  ;;  %p728_p13 = scmp.lt.s32.totalorder %s722_s27, %s722_s27 }
  0x1e   :  { %p729_p0 = por %p728_p13, %p727_p12 }
  0x20   :  { %p730_p1 = pnand %p729_p0, %p723_p11 }
  0x22   :  { %733 = shalt.err (!%p730_p1)
}
  0x23   :  { %45 = dma.hbm_to_vmem [thread:$0]  %s1026_s1, 256, %s40_s18, [#allocation6], %s809_s13, %s809_s13, %s810_s14  }
  0x24   :  { %800 = dma.done.wait [#allocation3], 256  }
  0x25   :  { %801 = vsyncadd [#allocation3], 4294967040 }
  0x26   :  { %802 = dma.done.wait [#allocation6], 256  }
  0x27   :  { %803 = vsyncadd [#allocation6], 4294967040  ;;  %v812_v0 = vmov 0.0|0.0   ;;  %vm813_vm0 = vmmov 0   ;;  %v814_v1 = vmov 0.0   ;;  %v815_v2 = vmov 0  }
  0x28   :  { %657 = vmatprep.subr.bf16.mxu0 %v812_v0  ;;  %634 = vmatprep.mubr.msk.f32.mxu0 %vm813_vm0, %v814_v1  ;;  %v69_v3 = vld [vmem:[%s1031_s6] sm:$0xff]  ;;  %v70_v4 = vld [vmem:[%s1031_s6 + $0x8] sm:$0xff]  ;;  %v71_v5 = vld [vmem:[%s1031_s6 + $0x10] sm:$0xff]  ;;  %vm80_vm1 = vcmask 261120   ;;  %v816_v12 = vmov 1966171168   ;;  %v160_v14 = vlaneseq }
  0x29   :  { %677 = vset.pattern.permute.xlu0 %v815_v2  ;;  %637 = vmatprep.subr.mxu1 %v814_v1  ;;  %v658_v6 = vpack.c.bf16 %v70_v4, %v69_v3  ;;  %v72_v7 = vld [vmem:[%s1031_s6 + $0x18] sm:$0xff]  ;;  %v191_v8 = vld [vmem:[%s1029_s4] sm:$0xff]  ;;  %v192_v10 = vld [vmem:[%s1029_s4 + $0x8] sm:$0xff]  ;;  %v158_v13 = vunpack.c.l.s4 %v816_v12  ;;  %vm366_vm2 = vcmask 57344   ;;  %vm397_vm3 = vcmask 64512   ;;  %s817_s1 = smov [#allocation8]  }
  0x2a   :  { %639 = vmatprep.mubr.msk.f32.mxu1 %vm813_vm0, %v814_v1  ;;  %196 = vperm.xlu0 %677, %v191_v8   ;;  %v661_v9 = vpack.c.bf16 %v72_v7, %v71_v5  ;;  %v68_v11 = vld [vmem:[%s1027_s2] sm:$0x3]  ;;  %v161_v16 = vshrl.u32 %v160_v14, 7  ;;  %v154_v28 = vld [vmem:[#allocation5] sm:$0xff]  ;;  %v155_v33 = vld [vmem:[#allocation5 + $0x8] sm:$0xff]  ;;  %s572_s29 = sshll.u32 %s817_s1, 4  ;;  %s573_s29 = int_to_ptr.vmem [resolvable:$true] %s572_s29 }
  0x2b   :  { %659 = vmatpush3.bf16.msra.mxu0 %v658_v6  ;;  %v159_v15 = vunpack.c.0.s8 %v158_v13  ;;  %v604_v17 = vld [vmem:[%s1032_s7] ss:$0 sm:$0xff]  ;;  %v380_v57 = vld [vmem:[%s1028_s3 + $0x1] sm:$0x1]  ;;  %v396_v2 = vld [vmem:[#allocation2 + $0x8] sm:$0xff]  ;;  %s734_s30 = scalar_lea.vmem %s573_s29, 32  ;;  %p739_p3 = scmp.lt.s32.totalorder %s573_s29, %s573_s29 }
  0x2c   :  { %660 = vmatprep.subr.bf16.mxu0 %v812_v0  ;;  %v181_v24 = vsub.s32 0, %v161_v16  ;;  %v606_v25 = vld [vmem:[%s1033_s8] ss:$0 sm:$0xff]  ;;  %v382_v60 = vsub.f32 1.0, %v380_v57  ;;  %p735_p2 = scmp.ne.s32.totalorder %s573_s29, %s734_s30  ;;  %p740_p4 = scmp.lt.s32.totalorder %s734_s30, %s734_s30 }
  0x2d   :  { %v162_v18 = vsub.s32 %v159_v15, %v161_v16  ;;  %v216_v41 = vld [vmem:[%s1034_s9] sm:$0x1] }
  0x2e   :  { %201 = vperm.xlu0 %677, %v192_v10   ;;  %v379_v55 = vld [vmem:[%s1028_s3] sm:$0x1]  ;;  %v550_v10 = vld [vmem:[%s1030_s5 + $0x1] sm:$0x1]  ;;  %p741_p5 = por %p740_p4, %p739_p3 }
  0x2f   :  { %662 = vmatpush3.bf16.msra.mxu0 %v661_v9  ;;  %v381_v56 = vsub.f32 1.0, %v379_v55  ;;  %v549_v6 = vld [vmem:[%s1030_s5] sm:$0x1] }
  0x30   :  { %647 = vmatprep.subr.mxu0 %v814_v1  ;;  %p742_p6 = pnand %p741_p5, %p735_p2 }
  0x32   :  { %635 = vmatmul.mubr.msk.f32.vlgmr.msra.gmra.mrb[0].mxu0 %vm80_vm1, %v68_v11 }
  0x33   :  { %649 = vmatprep.mubr.msk.f32.mxu0 %vm813_vm0, %v814_v1 }
  0xa9   :  { %v197_v22 = vpop.permute.xlu0 %196 }
  0xaa   :  { %v210_v31 = vmul.f32 %v606_v25, %v197_v22 }
  0xad   :  { %v202_v32 = vpop.permute.xlu0 %201 }
  0xae   :  { %v211_v38 = vmul.f32 %v606_v25, %v202_v32 }
 0x105   :  { %v150_v19 = vpop.f32.mrb[0].mxu0 }
 0x106   :  { %v151_v20 = vadd.f32 %v604_v17, %v150_v19  ;;  %v636_v21 = vpop.f32.mrb[1].mxu0 }
 0x108   :  { %v163_v23 = vrot.slane %v151_v20, %v162_v18 }
 0x10a   :  { %v164_v26 = vcombine.high %v163_v23, %v163_v23  ;;  %v171_v27 = vrot.slane %v163_v23, %v162_v18 }
 0x10c   :  { %v178_v29 = vrot.slane %v164_v26, %v162_v18  ;;  %v182_v30 = vrot.slane %v171_v27, %v181_v24 }
 0x10e   :  { %v189_v34 = vadd.f32 %v182_v30, %v154_v28  ;;  %v186_v35 = vrot.slane %v178_v29, %v181_v24 }
 0x110   :  { %v212_v36 = vadd.f32 %v210_v31, %v189_v34  ;;  %v190_v37 = vadd.f32 %v186_v35, %v155_v33 }
 0x112   :  { %678 = vtanh.f32 %v212_v36  ;;  %v213_v39 = vadd.f32 %v211_v38, %v190_v37 }
 0x114   :  { %680 = vtanh.f32 %v213_v39 }
 0x11c   :  { %v679_v40 = vpop.eup %678 }
 0x11d   :  { %638 = vmatpush3.xpose.msk.msra.mxu1 %vm80_vm1, %v679_v40 }
 0x11e   :  { %642 = vmatprep.subr.mxu1 %v814_v1  ;;  %v681_v42 = vpop.eup %680 }
 0x120   :  { %640 = vmatmul.mubr.msk.f32.vlgmr.msra.gmra.mrb[0].mxu1 %vm80_vm1, %v216_v41 }
 0x121   :  { %643 = vmatpush3.xpose.msk.msra.mxu1 %vm80_vm1, %v681_v42  ;;  %644 = vmatprep.mubr.msk.f32.mxu1 %vm813_vm0, %v814_v1 }
 0x122   :  { %652 = vmatprep.subr.mxu1 %v814_v1 }
 0x124   :  { %645 = vmatmul.mubr.msk.f32.vlgmr.msra.gmra.mrb[2].mxu1 %vm80_vm1, %v216_v41 }
 0x125   :  { %654 = vmatprep.mubr.msk.f32.mxu1 %vm813_vm0, %v814_v1  ;;  %v395_v1 = vld [vmem:[#allocation2] sm:$0xff]  ;;  %653 = vmatpush3.msra.mxu1 %v396_v2 }
 0x126   :  { %648 = vmatpush3.msra.mxu0 %v395_v1 }
 0x1f3   :  { %v289_v43 = vpop.f32.mrb[0].mxu1 }
 0x1f4   :  { %v641_v44 = vpop.f32.mrb[1].mxu1  ;;  %v367_v45 = vsel %vm366_vm2, %v289_v43, -inf }
 0x1f5   :  { %368 = vmax.xlane.f32.xlu1 %v367_v45 }
 0x1f7   :  { %v362_v46 = vpop.f32.mrb[2].mxu1 }
 0x1f8   :  { %v646_v47 = vpop.f32.mrb[3].mxu1  ;;  %v370_v48 = vsel %vm366_vm2, %v362_v46, -inf }
 0x1f9   :  { %371 = vmax.xlane.f32.xlu1 %v370_v48 }
 0x282   :  { %v369_v49 = vpop.xlane.xlu1 %368 }
 0x283   :  { %v373_v50 = vsub.f32 %v289_v43, %v369_v49 }
 0x285   :  { %v375_v51 = vmul.f32 1.442695, %v373_v50 }
 0x286   :  { %v372_v52 = vpop.xlane.xlu1 %371 }
 0x287   :  { %682 = vpow2.f32 %v375_v51  ;;  %v374_v53 = vsub.f32 %v362_v46, %v372_v52 }
 0x289   :  { %v377_v54 = vmul.f32 1.442695, %v374_v53 }
 0x28b   :  { %684 = vpow2.f32 %v377_v54 }
 0x291   :  { %v683_v58 = vpop.eup %682 }
 0x292   :  { %v383_v59 = vmul.f32 %v683_v58, %v381_v56 }
 0x294   :  { %v385_v61 = vsel %vm366_vm2, %v383_v59, 0.0 }
 0x295   :  { %v685_v62 = vpop.eup %684  ;;  %386 = vadd.xlane.f32.xlu0 %v385_v61 }
 0x296   :  { %v384_v63 = vmul.f32 %v685_v62, %v382_v60 }
 0x298   :  { %v388_v0 = vsel %vm366_vm2, %v384_v63, 0.0 }
 0x299   :  { %389 = vadd.xlane.f32.xlu1 %v388_v0 }
 0x322   :  { %v387_v3 = vpop.xlane.xlu0 %386 }
 0x323   :  { %686 = vrcp.f32 %v387_v3 }
 0x326   :  { %v390_v4 = vpop.xlane.xlu1 %389 }
 0x327   :  { %688 = vrcp.f32 %v390_v4 }
 0x32d   :  { %v687_v5 = vpop.eup %686 }
 0x32e   :  { %v392_v7 = vmul.f32 %v687_v5, %v383_v59 }
 0x330   :  { %v551_v8 = vadd.f32 %v549_v6, %v392_v7  ;;  %547 = vst.msk [vmem:[#allocation8] sm:$0x1] %vm366_vm2, %v392_v7  ;;  %650 = vmatmul.mubr.msk.f32.vlgmr.msra.gmra.mrb[2].mxu0 %vm397_vm3, %v392_v7 }
 0x331   :  { %v689_v9 = vpop.eup %688 }
 0x332   :  { %553 = vst.msk [vmem:[#allocation10] sm:$0x1] %vm366_vm2, %v551_v8  ;;  %v394_v11 = vmul.f32 %v689_v9, %v384_v63 }
 0x334   :  { %v552_v12 = vadd.f32 %v550_v10, %v394_v11  ;;  %548 = vst.msk [vmem:[#allocation8 + $0x1] sm:$0x1] %vm366_vm2, %v394_v11  ;;  %655 = vmatmul.mubr.msk.f32.vlgmr.msra.gmra.mrb[4].mxu1 %vm397_vm3, %v394_v11 }
 0x336   :  { %554 = vst.msk [vmem:[#allocation10 + $0x1] sm:$0x1] %vm366_vm2, %v552_v12 }
 0x337   :  { %745 = shalt.err (!%p742_p6)
}
 0x338   :  { %s746_s14 = scalar_lea.hbm %s1036_s11, 32 }
 0x339   :  { %p747_p7 = scmp.ne.s32.totalorder %s1036_s11, %s746_s14  ;;  %p750_p8 = scmp.lt.u32.totalorder %s746_s14, %s1036_s11 }
 0x33b   :  { %p752_p9 = pnand %p750_p8, %p747_p7 }
 0x33d   :  { %755 = shalt.err (!%p752_p9)
}
 0x33e   :  { %s818_s19 = smov 16   ;;  %s819_s20 = smov 1  }
 0x33f   :  { %578 = dma.vmem_to_hbm [thread:$0]  %s573_s29, 32, %s1036_s11, [#allocation9], %s818_s19, %s818_s19, %s819_s20  }
 0x340   :  { %s820_s4 = smov [#allocation10]  }
 0x341   :  { %s584_s6 = sshll.u32 %s820_s4, 4  ;;  %s585_s6 = int_to_ptr.vmem [resolvable:$true] %s584_s6 }
 0x342   :  { %s756_s2 = scalar_lea.vmem %s585_s6, 32  ;;  %p761_p11 = scmp.lt.s32.totalorder %s585_s6, %s585_s6 }
 0x343   :  { %p757_p10 = scmp.ne.s32.totalorder %s585_s6, %s756_s2  ;;  %p762_p12 = scmp.lt.s32.totalorder %s756_s2, %s756_s2 }
 0x345   :  { %p763_p13 = por %p762_p12, %p761_p11 }
 0x347   :  { %p764_p0 = pnand %p763_p13, %p757_p10 }
 0x349   :  { %767 = shalt.err (!%p764_p0)
}
 0x34a   :  { %s768_s8 = scalar_lea.hbm %s1037_s12, 32 }
 0x34b   :  { %p769_p1 = scmp.ne.s32.totalorder %s1037_s12, %s768_s8  ;;  %p772_p2 = scmp.lt.u32.totalorder %s768_s8, %s1037_s12 }
 0x34d   :  { %p774_p3 = pnand %p772_p2, %p769_p1 }
 0x34f   :  { %777 = shalt.err (!%p774_p3)
}
 0x350   :  { %590 = dma.vmem_to_hbm [thread:$0]  %s585_s6, 32, %s1037_s12, [#allocation9], %s818_s19, %s818_s19, %s819_s20   ;;  %vm544_vm4 = vcmask 253952  }
 0x351   :  { %s821_s0 = smov [#allocation7]  }
 0x352   :  { %s560_s22 = sshll.u32 %s821_s0, 4  ;;  %s561_s22 = int_to_ptr.vmem [resolvable:$true] %s560_s22 }
 0x353   :  { %s778_s28 = scalar_lea.vmem %s561_s22, 32  ;;  %p783_p5 = scmp.lt.s32.totalorder %s561_s22, %s561_s22 }
 0x354   :  { %p779_p4 = scmp.ne.s32.totalorder %s561_s22, %s778_s28  ;;  %p784_p6 = scmp.lt.s32.totalorder %s778_s28, %s778_s28 }
 0x356   :  { %p785_p7 = por %p784_p6, %p783_p5 }
 0x358   :  { %p786_p8 = pnand %p785_p7, %p779_p4 }
 0x403   :  { %v467_v13 = vpop.f32.mrb[2].mxu0 }
 0x404   :  { %545 = vst.msk [vmem:[#allocation7] sm:$0x1] %vm544_vm4, %v467_v13  ;;  %v651_v14 = vpop.f32.mrb[3].mxu0 }
 0x407   :  { %v540_v15 = vpop.f32.mrb[4].mxu1 }
 0x408   :  { %546 = vst.msk [vmem:[#allocation7 + $0x1] sm:$0x1] %vm544_vm4, %v540_v15  ;;  %v656_v16 = vpop.f32.mrb[5].mxu1 }
 0x409   :  { %789 = shalt.err (!%p786_p8)
}
 0x40a   :  { %s790_s12 = scalar_lea.hbm %s1035_s10, 32 }
 0x40b   :  { %p791_p9 = scmp.ne.s32.totalorder %s1035_s10, %s790_s12  ;;  %p794_p10 = scmp.lt.u32.totalorder %s790_s12, %s1035_s10 }
 0x40d   :  { %p796_p11 = pnand %p794_p10, %p791_p9 }
 0x40f   :  { %799 = shalt.err (!%p796_p11)
}
 0x410   :  { %566 = dma.vmem_to_hbm [thread:$0]  %s561_s22, 32, %s1035_s10, [#allocation4], %s818_s19, %s818_s19, %s819_s20  }
 0x411   :  { %804 = dma.done.wait [#allocation4], 32  }
 0x412   :  { %805 = vsyncadd [#allocation4], 4294967264 }
 0x413   :  { %806 = dma.done.wait [#allocation9], 64  }
 0x414   :  { %807 = vsyncadd [#allocation9], 4294967232 }
 0x415   :  { %600 = vsyncpa [#allocation3], 1 }
 0x416   :  { %601 = vsyncpa [#allocation6], 1 }
 0x417   :  { %602 = vsyncpa [#allocation4], 1 }
 0x418   :  { %603 = vsyncpa [#allocation9], 1 }

</bundles_post_ra>
